<compile_context>
chip_gen: v7x
topology: tpu7x:2x2x1
jax: 0.10.0
libtpu: 0.0.40
codegen_flags: <defaults>
</compile_context>

<pallas_src>
import jax
import jax.numpy as jnp
from jax.experimental import pallas as pl
from jax.experimental.pallas import tpu as pltpu

EPS = 1e-30                        # applied after the in-kernel upcast to f32
_TILE_BYTES = 8 * 1024 * 1024      # per-(rows, D) input tile byte budget
_VMEM_LIMIT = 48 * 1024 * 1024     # scoped-VMEM request; < v7x's 64 MiB physical


def _round_up(x, m):
    return ((x + m - 1) // m) * m


def _row_budget(D, itemsize):
    """Largest 8-aligned row count whose (rows, D) tile fits _TILE_BYTES."""
    rows = _TILE_BYTES // (itemsize * max(D, 1))
    return max(8, (rows // 8) * 8)


def _bce_only_last(pred, target, last):
    B, S, D = pred.shape

    # Gather just the B last-basket rows (B*D elements) with XLA's gather; the
    # Pallas kernel then streams lane-dense (Bt, D) chunks instead of paying one
    # grid step (~0.35 us) + one tiny DMA per batch element.
    # NOTE: out-of-range `last` is clamped (torch indexing would raise instead).
    idx = jnp.clip(last.astype(jnp.int32) - 1, 0, S - 1)
    p_rows = jnp.take_along_axis(pred, idx[:, None, None], axis=1)[:, 0, :]
    t_rows = jnp.take_along_axis(target, idx[:, None, None], axis=1)[:, 0, :]

    Bt = min(_round_up(B, 8), _row_budget(D, pred.dtype.itemsize))
    B_pad = _round_up(B, Bt)
    if B_pad != B:
        # Padded rows use pred = 1, target = 1  ->  loss = 1  ->  log = 0.
        p_rows = jnp.pad(p_rows, ((0, B_pad - B), (0, 0)), constant_values=1.0)
        t_rows = jnp.pad(t_rows, ((0, B_pad - B), (0, 0)), constant_values=1.0)
    n_chunks = B_pad // Bt

    def kernel(p_ref, t_ref, out_ref):
        p = p_ref[...].astype(jnp.float32)          # in-kernel upcast
        t = t_ref[...].astype(jnp.float32)
        loss = jnp.maximum(jnp.where(t == 0.0, 1.0 - p, p), EPS)
        # Sublane-grouped partial sum: pure VALU adds, no in-kernel XLU reduce;
        # the final scalar combine happens once in the wrapper.
        out_ref[...] = jnp.sum(jnp.log(loss).reshape(Bt // 8, 8, D), axis=0)

    partials = pl.pallas_call(
        kernel,
        out_shape=jax.ShapeDtypeStruct((n_chunks * 8, D), jnp.float32),
        grid_spec=pltpu.PrefetchScalarGridSpec(
            num_scalar_prefetch=0,
            grid=(n_chunks,),
            in_specs=[pl.BlockSpec((Bt, D), lambda i: (i, 0)),
                      pl.BlockSpec((Bt, D), lambda i: (i, 0))],
            out_specs=pl.BlockSpec((8, D), lambda i: (i, 0)),
        ),
        compiler_params=pltpu.CompilerParams(
            dimension_semantics=("parallel",),      # independent chunks; megacore on v7x
            vmem_limit_bytes=_VMEM_LIMIT),
    )(p_rows, t_rows)
    return -jnp.sum(partials) / (B * D)


def _bce_masked_mean(pred, target):
    B, S, D = pred.shape

    # Sequence tile: as big as the byte budget allows (multiple of 8).  For
    # S < 8 take the whole sequence; otherwise a cdiv grid + in-kernel tail
    # masking so an awkward S never forces a whole-sequence block (v7x VMEM).
    if S <= 8:
        Ts = S
    else:
        Ts = min((S // 8) * 8, _row_budget(D, pred.dtype.itemsize))
    n_s = pl.cdiv(S, Ts)
    tail = (S % Ts) != 0
    acc_rows = 8 if Ts % 8 == 0 else 1

    def kernel(pred_ref, target_ref, sum_ref, cnt_ref, acc_ref, cnt_acc_ref):
        si = pl.program_id(1)

        @pl.when(si == 0)
        def _():
            acc_ref[...] = jnp.zeros_like(acc_ref)
            cnt_acc_ref[...] = jnp.zeros_like(cnt_acc_ref)

        p = pred_ref[0].astype(jnp.float32)          # (Ts, D), in-kernel upcast
        t = target_ref[0].astype(jnp.float32)
        if tail:
            # Rows past S in the last tile hold unspecified data: sanitize them
            # before the log and exclude them from the row count.
            row = jax.lax.broadcasted_iota(jnp.int32, (Ts, 1), 0) + si * Ts
            valid = row < S
            p = jnp.where(valid, p, 0.5)             # keeps log() finite
            t = jnp.where(valid, t, 0.0)             # empty basket -> masked out

        # NOTE: matches the torch mask only for non-negative / binary targets.
        mask_f = (jnp.sum(t, axis=-1, keepdims=True) > 0.0).astype(jnp.float32)
        loss = jnp.maximum(jnp.where(t == 0.0, 1.0 - p, p), EPS)
        logs = jnp.log(loss) * mask_f                                   # (Ts, D)

        # Sublane-grouped lane-dense accumulation (pure VALU adds per step); the
        # 8 -> 1 sublane collapse happens once per batch row, at the final step.
        if acc_rows == 8:
            acc_ref[...] += jnp.sum(logs.reshape(Ts // 8, 8, D), axis=0)
        else:
            acc_ref[...] += jnp.sum(logs, axis=0, keepdims=True)
        cnt_acc_ref[...] += jnp.sum(mask_f, axis=0, keepdims=True)      # bcast over 128 lanes

        @pl.when(si == n_s - 1)
        def _():
            sum_ref[...] = jnp.sum(acc_ref[...], axis=0, keepdims=True)[None]
            cnt_ref[...] = cnt_acc_ref[...][None]

    sums, cnts = pl.pallas_call(
        kernel,
        out_shape=(jax.ShapeDtypeStruct((B, 1, D), jnp.float32),
                   jax.ShapeDtypeStruct((B, 1, 128), jnp.float32)),
        grid_spec=pltpu.PrefetchScalarGridSpec(
            num_scalar_prefetch=0,
            grid=(B, n_s),
            in_specs=[pl.BlockSpec((1, Ts, D), lambda b, s: (b, s, 0)),
                      pl.BlockSpec((1, Ts, D), lambda b, s: (b, s, 0))],
            out_specs=(
                pl.BlockSpec((1, 1, D), lambda b, s: (b, 0, 0)),
                pl.BlockSpec((1, 1, 128), lambda b, s: (b, 0, 0)),
            ),
            scratch_shapes=[pltpu.VMEM((acc_rows, D), jnp.float32),
                            pltpu.VMEM((1, 128), jnp.float32)],
        ),
        compiler_params=pltpu.CompilerParams(
            # Batch axis parallel (megacore on v7x), sequence axis = reduction.
            dimension_semantics=("parallel", "arbitrary"),
            vmem_limit_bytes=_VMEM_LIMIT),
    )(pred, target)

    n_rows = jnp.sum(cnts[:, 0, 0])
    return -jnp.sum(sums) / (n_rows * D)


def custom_bce(pred, target, last=None, only_last=True):
    """JAX/Pallas equivalent of custom_BCE(only_last).forward(pred, target, last).

    pred/target stream in their original dtype (f32/bf16/f16) and are upcast to
    f32 inside the kernels (the 1e-30 clamp would underflow in bf16).
    """
    if only_last:
        if last is None:
            raise ValueError("`last` is required when only_last=True")
        return _bce_only_last(pred, target, last)
    return _bce_masked_mean(pred, target)


if __name__ == "__main__":
    key = jax.random.PRNGKey(0)
    B, S, D = 2, 8, 32
    k1, k2, k3 = jax.random.split(key, 3)

    # Deterministic synthetic inputs consistent with the module's forward().
    pred = jax.nn.sigmoid(jax.random.normal(k1, (B, S, D), jnp.float32))
    target = (jax.random.uniform(k2, (B, S, D)) < 0.3).astype(jnp.float32)
    target = target.at[:, 0, :].set(0.0)          # one empty basket per sequence
    last = jax.random.randint(k3, (B,), 2, S + 1, dtype=jnp.int32)   # 1-based

    # Pure-JAX references mirroring the PyTorch forward exactly.
    def ref_only_last(p, t, last_idx):
        p = p.astype(jnp.float32); t = t.astype(jnp.float32)
        p_l = p[jnp.arange(p.shape[0]), last_idx - 1, :]
        t_l = t[jnp.arange(p.shape[0]), last_idx - 1, :]
        l_l = jnp.maximum(jnp.where(t_l == 0, 1.0 - p_l, p_l), 1e-30)
        return -jnp.mean(jnp.log(l_l))

    def ref_masked(p, t):
        p = p.astype(jnp.float32); t = t.astype(jnp.float32)
        mask = jnp.sum(t, axis=2) > 0
        l_a = jnp.maximum(jnp.where(t == 0, 1.0 - p, p), 1e-30)
        return -jnp.sum(jnp.where(mask[:, :, None], jnp.log(l_a), 0.0)) / (
            jnp.sum(mask) * p.shape[2])

    # f32 inputs.
    loss_last = jax.block_until_ready(custom_bce(pred, target, last, only_last=True))
    loss_all = jax.block_until_ready(custom_bce(pred, target, only_last=False))
    assert jnp.allclose(loss_last, ref_only_last(pred, target, last),
                        rtol=1e-5, atol=1e-6), (loss_last, ref_only_last(pred, target, last))
    assert jnp.allclose(loss_all, ref_masked(pred, target),
                        rtol=1e-5, atol=1e-6), (loss_all, ref_masked(pred, target))

    # bf16 inputs stream at 2 B/elem and are upcast inside the kernels.
    pred_bf = pred.astype(jnp.bfloat16)
    target_bf = target.astype(jnp.bfloat16)
    loss_last_bf = jax.block_until_ready(custom_bce(pred_bf, target_bf, last, only_last=True))
    loss_all_bf = jax.block_until_ready(custom_bce(pred_bf, target_bf, only_last=False))
    assert jnp.allclose(loss_last_bf, ref_only_last(pred_bf, target_bf, last),
                        rtol=1e-5, atol=1e-5)
    assert jnp.allclose(loss_all_bf, ref_masked(pred_bf, target_bf),
                        rtol=1e-5, atol=1e-5)

    print("KERNEL_OK")
</pallas_src>

<mosaic_0001>
module attributes {stable_mosaic.version = 11 : i64} {
  func.func @kernel(%arg0: i32, %arg1: memref<8x32xf32, #tpu.memory_space<vmem>>, %arg2: memref<8x32xf32, #tpu.memory_space<vmem>>, %arg3: memref<8x32xf32, #tpu.memory_space<vmem>>) attributes {dimension_semantics = [#tpu.dimension_semantics<parallel>], iteration_bounds = array<i64: 1>, scalar_prefetch = 0 : i64, scratch_operands = 0 : i64, tpu.core_type = #tpu.core_type<tc>, window_params = [{transform_indices = @transform_0, window_bounds = array<i64: 8, 32>}, {transform_indices = @transform_1, window_bounds = array<i64: 8, 32>}, {transform_indices = @transform_2, window_bounds = array<i64: 8, 32>}]} {
    %c0 = arith.constant 0 : index
    %c0_0 = arith.constant 0 : index
    %0 = vector.load %arg1[%c0, %c0_0] : memref<8x32xf32, #tpu.memory_space<vmem>>, vector<8x32xf32>
    %c0_1 = arith.constant 0 : index
    %c0_2 = arith.constant 0 : index
    %1 = vector.load %arg2[%c0_1, %c0_2] : memref<8x32xf32, #tpu.memory_space<vmem>>, vector<8x32xf32>
    %cst = arith.constant 0.000000e+00 : f32
    %2 = vector.broadcast %cst : f32 to vector<8x32xf32>
    %3 = arith.cmpf oeq, %1, %2 : vector<8x32xf32>
    %cst_3 = arith.constant 1.000000e+00 : f32
    %4 = vector.broadcast %cst_3 : f32 to vector<8x32xf32>
    %5 = arith.subf %4, %0 : vector<8x32xf32>
    %6 = arith.select %3, %5, %0 : vector<8x32xi1>, vector<8x32xf32>
    %cst_4 = arith.constant 1.000000e-30 : f32
    %7 = vector.broadcast %cst_4 : f32 to vector<8x32xf32>
    %8 = arith.maximumf %6, %7 : vector<8x32xf32>
    %9 = math.log %8 : vector<8x32xf32>
    %10 = vector.shape_cast %9 : vector<8x32xf32> to vector<1x8x32xf32>
    %cst_5 = arith.constant dense<0.000000e+00> : vector<8x32xf32>
    %11 = vector.multi_reduction <add>, %10, %cst_5 [0] : vector<1x8x32xf32> to vector<8x32xf32>
    %c0_6 = arith.constant 0 : index
    %c0_7 = arith.constant 0 : index
    %12 = vector.load %arg3[%c0_6, %c0_7] : memref<8x32xf32, #tpu.memory_space<vmem>>, vector<8x32xf32>
    tpu.vector_store %arg3[%c0_6, %c0_7], %11 {strides = array<i32>} : memref<8x32xf32, #tpu.memory_space<vmem>>, vector<8x32xf32>,
    return
  }
  func.func @transform_0(%arg0: i32) -> (i32, i32) {
    %c0_i32 = arith.constant 0 : i32
    %c0_i32_0 = arith.constant 0 : i32
    return %arg0, %c0_i32 : i32, i32
  }
  func.func @transform_1(%arg0: i32) -> (i32, i32) {
    %c0_i32 = arith.constant 0 : i32
    %c0_i32_0 = arith.constant 0 : i32
    return %arg0, %c0_i32 : i32, i32
  }
  func.func @transform_2(%arg0: i32) -> (i32, i32) {
    %c0_i32 = arith.constant 0 : i32
    %c0_i32_0 = arith.constant 0 : i32
    return %arg0, %c0_i32 : i32, i32
  }
}

</mosaic_0001>

<bundles_post_ra>
// kernel: tpu_custom_call.1
= control target key start
LH: loop header
LB: loop body
LE: loop exit
PB: predicated region body
PF: predicated region fallthrough
CT: control target
= control target key end

     0   :  { %7 = vsyncpa [#allocation3], 0  ;;  %s194_s0 = inlined_call_operand.hbm [shape: f32[8,32], index: 0, kind: input, shape index: {}]   ;;  %s195_s1 = inlined_call_operand.hbm [shape: f32[8,32], index: 1, kind: input, shape index: {}]   ;;  %s196_s2 = inlined_call_operand.hbm [shape: f32[8,32], index: 2, kind: output, shape index: {}]  }
   0x1   :  { %8 = vsyncpa [#allocation6], 0 }
   0x2   :  { %9 = vsyncpa [#allocation4], 0  ;;  %s140_s9 = smov [#allocation2]   ;;  %s141_s11 = smov [#allocation5]  }
   0x3   :  { %s16_s10 = sshll.u32 %s140_s9, 4  ;;  %s26_s12 = sshll.u32 %s141_s11, 4  ;;  %s17_s10 = int_to_ptr.vmem [resolvable:$true] %s16_s10  ;;  %s27_s12 = int_to_ptr.vmem [resolvable:$true] %s26_s12 }
   0x4   :  { %s68_s15 = scalar_lea.hbm %s194_s0, 128 }
   0x5   :  { %p69_p0 = scmp.ne.s32.totalorder %s194_s0, %s68_s15  ;;  %p72_p1 = scmp.lt.u32.totalorder %s68_s15, %s194_s0 }
   0x7   :  { %p74_p2 = pnand %p72_p1, %p69_p0 }
   0x9   :  { %77 = shalt.err (!%p74_p2)
}
   0xa   :  { %s78_s20 = scalar_lea.vmem %s17_s10, 128  ;;  %p83_p4 = scmp.lt.s32.totalorder %s17_s10, %s17_s10 }
   0xb   :  { %p79_p3 = scmp.ne.s32.totalorder %s17_s10, %s78_s20  ;;  %p84_p5 = scmp.lt.s32.totalorder %s78_s20, %s78_s20 }
   0xd   :  { %p85_p6 = por %p84_p5, %p83_p4 }
   0xf   :  { %p86_p7 = pnand %p85_p6, %p79_p3 }
  0x11   :  { %89 = shalt.err (!%p86_p7)
}
  0x12   :  { %19 = dma.hbm_to_vmem [thread:$0]  %s194_s0, 128, %s17_s10, [#allocation3]  }
  0x13   :  { %s90_s25 = scalar_lea.hbm %s195_s1, 128 }
  0x14   :  { %p91_p8 = scmp.ne.s32.totalorder %s195_s1, %s90_s25  ;;  %p94_p9 = scmp.lt.u32.totalorder %s90_s25, %s195_s1 }
  0x16   :  { %p96_p10 = pnand %p94_p9, %p91_p8 }
  0x18   :  { %99 = shalt.err (!%p96_p10)
}
  0x19   :  { %s100_s30 = scalar_lea.vmem %s27_s12, 128  ;;  %p105_p12 = scmp.lt.s32.totalorder %s27_s12, %s27_s12 }
  0x1a   :  { %p101_p11 = scmp.ne.s32.totalorder %s27_s12, %s100_s30  ;;  %p106_p13 = scmp.lt.s32.totalorder %s100_s30, %s100_s30 }
  0x1c   :  { %p107_p0 = por %p106_p13, %p105_p12 }
  0x1e   :  { %p108_p1 = pnand %p107_p0, %p101_p11 }
  0x20   :  { %111 = shalt.err (!%p108_p1)
}
  0x21   :  { %29 = dma.hbm_to_vmem [thread:$0]  %s195_s1, 128, %s27_s12, [#allocation6]  }
  0x22   :  { %134 = dma.done.wait [#allocation3], 128  }
  0x23   :  { %135 = vsyncadd [#allocation3], 4294967168 }
  0x24   :  { %136 = dma.done.wait [#allocation6], 128  }
  0x25   :  { %137 = vsyncadd [#allocation6], 4294967168  ;;  %v36_v0 = vld [vmem:[#allocation2] sm:$0xff]  ;;  %v37_v1 = vld [vmem:[#allocation5] sm:$0xff]  ;;  %s142_s4 = smov [#allocation7]   ;;  %vm45_vm1 = vcmask 261120  }
  0x26   :  { %vm38_vm0 = vcmp.eq.f32.partialorder %v37_v1, 0.0  ;;  %v39_v2 = vsub.f32 1.0, %v36_v0  ;;  %s53_s5 = sshll.u32 %s142_s4, 4  ;;  %s54_s5 = int_to_ptr.vmem [resolvable:$true] %s53_s5 }
  0x27   :  { %s112_s6 = scalar_lea.vmem %s54_s5, 128  ;;  %p117_p3 = scmp.lt.s32.totalorder %s54_s5, %s54_s5 }
  0x28   :  { %v40_v3 = vsel %vm38_vm0, %v39_v2, %v36_v0  ;;  %p113_p2 = scmp.ne.s32.totalorder %s54_s5, %s112_s6  ;;  %p118_p4 = scmp.lt.s32.totalorder %s112_s6, %s112_s6 }
  0x29   :  { %v41_v4 = vmax.f32 %v40_v3, 1e-30 }
  0x2a   :  { %p119_p5 = por %p118_p4, %p117_p3 }
  0x2b   :  { %66 = vlog2.f32 %v41_v4 }
  0x2c   :  { %p120_p6 = pnand %p119_p5, %p113_p2 }
  0x35   :  { %v67_v5 = vpop.eup %66 }
  0x36   :  { %v43_v6 = vmul.f32 0.6931472, %v67_v5 }
  0x38   :  { %46 = vst.msk [vmem:[#allocation7] sm:$0xff] %vm45_vm1, %v43_v6 }
  0x39   :  { %123 = shalt.err (!%p120_p6)
}
  0x3a   :  { %s124_s8 = scalar_lea.hbm %s196_s2, 128 }
  0x3b   :  { %p125_p7 = scmp.ne.s32.totalorder %s196_s2, %s124_s8  ;;  %p128_p8 = scmp.lt.u32.totalorder %s124_s8, %s196_s2 }
  0x3d   :  { %p130_p9 = pnand %p128_p8, %p125_p7 }
  0x3f   :  { %133 = shalt.err (!%p130_p9)
}
  0x40   :  { %56 = dma.vmem_to_hbm [thread:$0]  %s54_s5, 128, %s196_s2, [#allocation4]  }
  0x41   :  { %138 = dma.done.wait [#allocation4], 128  }
  0x42   :  { %139 = vsyncadd [#allocation4], 4294967168 }
  0x43   :  { %60 = vsyncpa [#allocation3], 1 }
  0x44   :  { %61 = vsyncpa [#allocation6], 1 }
  0x45   :  { %62 = vsyncpa [#allocation4], 1 }

</bundles_post_ra>
